<compile_context>
chip_gen: v7x
topology: tpu7x:2x2x1
jax: 0.10.0
libtpu: 0.0.40
codegen_flags: <defaults>
</compile_context>

<pallas_src>
import functools
import math

import jax
import jax.numpy as jnp
from jax.experimental import pallas as pl
from jax.experimental.pallas import tpu as pltpu


_LN10 = math.log(10.0)


def _round_up(x, m):
    return ((x + m - 1) // m) * m


def _sid_kernel(p_ref, q_ref, o_ref, row_acc,
                *, eps, rows, cols, tr, tc, mask_rows, mask_cols):
    j = pl.program_id(1)

    @pl.when(j == 0)
    def _():
        row_acc[...] = jnp.zeros_like(row_acc)

    p = p_ref[...].astype(jnp.float32)
    q = q_ref[...].astype(jnp.float32)

    # p*log10((p+e)/(q+e)) + q*log10((q+e)/(p+e))
    #   == (p - q) * (ln(p+e) - ln(q+e)) / ln(10)
    # The 1/ln(10) factor (and 1/denom) are folded into the wrapper-side scale.
    kl = (p - q) * (jnp.log(p + eps) - jnp.log(q + eps))

    # Mask out-of-bounds rows/cols of ragged boundary tiles (no jnp.pad in the
    # wrapper). Static Python flags -> no cost when shapes divide evenly.
    if mask_rows or mask_cols:
        i = pl.program_id(0)
        ok = None
        if mask_rows:
            r = i * tr + jax.lax.broadcasted_iota(jnp.int32, (tr, tc), 0)
            ok = r < rows
        if mask_cols:
            c = j * tc + jax.lax.broadcasted_iota(jnp.int32, (tr, tc), 1)
            cm = c < cols
            ok = cm if ok is None else (ok & cm)
        kl = jnp.where(ok, kl, 0.0)

    # Per-(n,c) partial row sums, accumulated across column tiles.
    row_acc[...] += jnp.sum(kl, axis=1, keepdims=True)

    @pl.when(j == pl.num_programs(1) - 1)
    def _():
        # Row sums are complete for this row tile -> abs, then reduce to one
        # partial per row tile (masked/padded rows contribute exactly 0).
        o_ref[...] = jnp.sum(jnp.abs(row_acc[...]), keepdims=True)


def sid_loss_pallas(p, q, eps=0.001):
    """SID loss matching the PyTorch SIDLoss.forward exactly.

    p, q: (N, C, H, W) arrays (any float dtype; computed in f32 in-kernel).
    Returns a float32 scalar.
    """
    N, C, H, W = p.shape
    rows = N * C
    cols = H * W

    # Reshape only (no cast, no pad): keep HBM traffic at exactly one read of
    # each input in its native dtype.
    p2 = jnp.reshape(p, (rows, cols))
    q2 = jnp.reshape(q, (rows, cols))

    # Tile sizes: 2 inputs x 2 pipeline buffers x (TR*TC*4 B) must stay well
    # under VMEM on all generations (512x1024 f32 = 2 MiB/block -> 8 MiB).
    TR = min(512, _round_up(rows, 8))
    TC = min(1024, _round_up(cols, 128))
    grid = (pl.cdiv(rows, TR), pl.cdiv(cols, TC))

    mask_rows = (rows % TR) != 0
    mask_cols = (cols % TC) != 0

    kernel = functools.partial(
        _sid_kernel, eps=float(eps), rows=rows, cols=cols,
        tr=TR, tc=TC, mask_rows=mask_rows, mask_cols=mask_cols)

    itemsize = jnp.dtype(p2.dtype).itemsize
    cost = pl.CostEstimate(
        flops=5 * rows * cols,
        transcendentals=2 * rows * cols,
        bytes_accessed=2 * rows * cols * itemsize + grid[0] * 4,
    )

    partials = pl.pallas_call(
        kernel,
        out_shape=jax.ShapeDtypeStruct((grid[0], 1), jnp.float32),
        grid_spec=pltpu.PrefetchScalarGridSpec(
            num_scalar_prefetch=0,
            grid=grid,
            in_specs=[
                pl.BlockSpec((TR, TC), lambda i, j: (i, j)),
                pl.BlockSpec((TR, TC), lambda i, j: (i, j)),
            ],
            out_specs=pl.BlockSpec((1, 1), lambda i, j: (i, 0)),
            scratch_shapes=[pltpu.VMEM((TR, 1), jnp.float32)],
        ),
        compiler_params=pltpu.CompilerParams(
            dimension_semantics=("parallel", "arbitrary"),
            vmem_limit_bytes=32 * 1024 * 1024,
        ),
        cost_estimate=cost,
    )(p2, q2)

    # abs already applied per complete row inside the kernel; partials are
    # per-row-tile sums. Single final scale: 1/ln(10) from the natural-log
    # rewrite and the 1/(N*C*H*W) normalization.
    scale = 1.0 / (_LN10 * N * C * H * W)
    return jnp.sum(partials) * scale


def sid_loss_ref(p, q, eps=0.001):
    """Pure-JAX reference mirroring the PyTorch code line by line."""
    N, C, H, W = p.shape
    p = p.astype(jnp.float32)
    q = q.astype(jnp.float32)
    kl_1 = p * jnp.log10((p + eps) / (q + eps))
    kl_2 = q * jnp.log10((q + eps) / (p + eps))
    sid = kl_1.sum(axis=2).sum(axis=2) + kl_2.sum(axis=2).sum(axis=2)
    sid = jnp.abs(sid)
    return jnp.sum(sid) / (N * H * W * C)


if __name__ == "__main__":
    key = jax.random.PRNGKey(0)
    k1, k2 = jax.random.split(key)

    # SID is meant for non-negative spectra; use uniform [0, 1) inputs.
    N, C, H, W = 2, 4, 16, 16
    p = jax.random.uniform(k1, (N, C, H, W), dtype=jnp.float32)
    q = jax.random.uniform(k2, (N, C, H, W), dtype=jnp.float32)

    out = jax.block_until_ready(sid_loss_pallas(p, q))
    ref = sid_loss_ref(p, q)
    assert jnp.allclose(out, ref, rtol=1e-5, atol=1e-6), (out, ref)

    # Ragged shape: exercises in-kernel masking and multi-column-tile
    # accumulation (rows=6 < 8, cols=1600 -> two 1024-wide column tiles).
    N2, C2, H2, W2 = 2, 3, 40, 40
    p2 = jax.random.uniform(k1, (N2, C2, H2, W2), dtype=jnp.float32)
    q2 = jax.random.uniform(k2, (N2, C2, H2, W2), dtype=jnp.float32)
    out2 = jax.block_until_ready(sid_loss_pallas(p2, q2))
    ref2 = sid_loss_ref(p2, q2)
    assert jnp.allclose(out2, ref2, rtol=1e-5, atol=1e-6), (out2, ref2)

    print("KERNEL_OK")
</pallas_src>

<mosaic_0001>
module attributes {stable_mosaic.version = 11 : i64} {
  func.func @_sid_kernel(%arg0: i32, %arg1: i32, %arg2: memref<8x256xf32, #tpu.memory_space<vmem>>, %arg3: memref<8x256xf32, #tpu.memory_space<vmem>>, %arg4: memref<1x1xf32, #tpu.memory_space<vmem>>, %arg5: memref<8x1xf32, #tpu.memory_space<vmem>>) attributes {dimension_semantics = [#tpu.dimension_semantics<parallel>, #tpu.dimension_semantics<arbitrary>], iteration_bounds = array<i64: 1, 1>, scalar_prefetch = 0 : i64, scratch_operands = 1 : i64, tpu.core_type = #tpu.core_type<tc>, window_params = [{transform_indices = @transform_0, window_bounds = array<i64: 8, 256>}, {transform_indices = @transform_1, window_bounds = array<i64: 8, 256>}, {transform_indices = @transform_2, window_bounds = array<i64: 1, 1>}]} {
    %c0_i32 = arith.constant 0 : i32
    %0 = arith.cmpi eq, %arg1, %c0_i32 : i32
    %1 = arith.extui %0 : i1 to i32
    %c0_i32_0 = arith.constant 0 : i32
    %2 = arith.cmpi ne, %1, %c0_i32_0 : i32
    scf.if %2 {
      %cst_12 = arith.constant 0.000000e+00 : f32
      %22 = vector.broadcast %cst_12 : f32 to vector<8x1xf32>
      %c0_13 = arith.constant 0 : index
      %c0_14 = arith.constant 0 : index
      %23 = vector.load %arg5[%c0_13, %c0_14] : memref<8x1xf32, #tpu.memory_space<vmem>>, vector<8x1xf32>
      tpu.vector_store %arg5[%c0_13, %c0_14], %22 {strides = array<i32>} : memref<8x1xf32, #tpu.memory_space<vmem>>, vector<8x1xf32>,
    } else {
    }
    %c0 = arith.constant 0 : index
    %c0_1 = arith.constant 0 : index
    %3 = vector.load %arg2[%c0, %c0_1] : memref<8x256xf32, #tpu.memory_space<vmem>>, vector<8x256xf32>
    %c0_2 = arith.constant 0 : index
    %c0_3 = arith.constant 0 : index
    %4 = vector.load %arg3[%c0_2, %c0_3] : memref<8x256xf32, #tpu.memory_space<vmem>>, vector<8x256xf32>
    %5 = arith.subf %3, %4 : vector<8x256xf32>
    %cst = arith.constant 1.000000e-03 : f32
    %6 = vector.broadcast %cst : f32 to vector<8x256xf32>
    %7 = arith.addf %3, %6 : vector<8x256xf32>
    %8 = math.log %7 : vector<8x256xf32>
    %cst_4 = arith.constant 1.000000e-03 : f32
    %9 = vector.broadcast %cst_4 : f32 to vector<8x256xf32>
    %10 = arith.addf %4, %9 : vector<8x256xf32>
    %11 = math.log %10 : vector<8x256xf32>
    %12 = arith.subf %8, %11 : vector<8x256xf32>
    %13 = arith.mulf %5, %12 : vector<8x256xf32>
    %c0_5 = arith.constant 0 : index
    %c0_6 = arith.constant 0 : index
    %14 = vector.load %arg5[%c0_5, %c0_6] : memref<8x1xf32, #tpu.memory_space<vmem>>, vector<8x1xf32>
    %cst_7 = arith.constant dense<0.000000e+00> : vector<8xf32>
    %15 = vector.multi_reduction <add>, %13, %cst_7 [1] : vector<8x256xf32> to vector<8xf32>
    %16 = vector.shape_cast %15 : vector<8xf32> to vector<8x1xf32>
    %17 = arith.addf %14, %16 : vector<8x1xf32>
    %c0_8 = arith.constant 0 : index
    %c0_9 = arith.constant 0 : index
    %18 = vector.load %arg5[%c0_8, %c0_9] : memref<8x1xf32, #tpu.memory_space<vmem>>, vector<8x1xf32>
    tpu.vector_store %arg5[%c0_8, %c0_9], %17 {strides = array<i32>} : memref<8x1xf32, #tpu.memory_space<vmem>>, vector<8x1xf32>,
    %c0_i32_10 = arith.constant 0 : i32
    %19 = arith.cmpi eq, %arg1, %c0_i32_10 : i32
    %20 = arith.extui %19 : i1 to i32
    %c0_i32_11 = arith.constant 0 : i32
    %21 = arith.cmpi ne, %20, %c0_i32_11 : i32
    scf.if %21 {
      %c0_12 = arith.constant 0 : index
      %c0_13 = arith.constant 0 : index
      %22 = vector.load %arg5[%c0_12, %c0_13] : memref<8x1xf32, #tpu.memory_space<vmem>>, vector<8x1xf32>
      %23 = math.absf %22 : vector<8x1xf32>
      %24 = vector.shape_cast %23 : vector<8x1xf32> to vector<1x8x1xf32>
      %cst_14 = arith.constant dense<0.000000e+00> : vector<1xf32>
      %25 = vector.multi_reduction <add>, %24, %cst_14 [1, 2] : vector<1x8x1xf32> to vector<1xf32>
      %26 = vector.shape_cast %25 : vector<1xf32> to vector<1x1x1xf32>
      %27 = vector.extract %26[0, 0, 0] : f32 from vector<1x1x1xf32>
      %28 = vector.broadcast %27 : f32 to vector<1x1xf32>
      %c0_15 = arith.constant 0 : index
      %c0_16 = arith.constant 0 : index
      %29 = vector.load %arg4[%c0_15, %c0_16] : memref<1x1xf32, #tpu.memory_space<vmem>>, vector<1x1xf32>
      tpu.vector_store %arg4[%c0_15, %c0_16], %28 {strides = array<i32>} : memref<1x1xf32, #tpu.memory_space<vmem>>, vector<1x1xf32>,
    } else {
    }
    return
  }
  func.func @transform_0(%arg0: i32, %arg1: i32) -> (i32, i32) {
    %c0_i32 = arith.constant 0 : i32
    return %arg0, %arg1 : i32, i32
  }
  func.func @transform_1(%arg0: i32, %arg1: i32) -> (i32, i32) {
    %c0_i32 = arith.constant 0 : i32
    return %arg0, %arg1 : i32, i32
  }
  func.func @transform_2(%arg0: i32, %arg1: i32) -> (i32, i32) {
    %c0_i32 = arith.constant 0 : i32
    %c0_i32_0 = arith.constant 0 : i32
    return %arg0, %c0_i32 : i32, i32
  }
}

</mosaic_0001>

<bundles_post_ra>
// kernel: tpu_custom_call.1
= control target key start
LH: loop header
LB: loop body
LE: loop exit
PB: predicated region body
PF: predicated region fallthrough
CT: control target
= control target key end

     0   :  { %7 = vsyncpa [#allocation4], 0  ;;  %s249_s0 = inlined_call_operand.hbm [shape: f32[8,256], index: 0, kind: input, shape index: {}]   ;;  %s250_s1 = inlined_call_operand.hbm [shape: f32[8,256], index: 1, kind: input, shape index: {}]   ;;  %s251_s2 = inlined_call_operand.hbm [shape: f32[1,1], index: 2, kind: output, shape index: {}]  }
   0x1   :  { %8 = vsyncpa [#allocation7], 0 }
   0x2   :  { %9 = vsyncpa [#allocation5], 0  ;;  %s191_s9 = smov [#allocation3]   ;;  %s192_s11 = smov [#allocation6]  }
   0x3   :  { %s16_s10 = sshll.u32 %s191_s9, 4  ;;  %s26_s12 = sshll.u32 %s192_s11, 4  ;;  %s17_s10 = int_to_ptr.vmem [resolvable:$true] %s16_s10  ;;  %s27_s12 = int_to_ptr.vmem [resolvable:$true] %s26_s12 }
   0x4   :  { %s119_s15 = scalar_lea.hbm %s249_s0, 256 }
   0x5   :  { %p120_p0 = scmp.ne.s32.totalorder %s249_s0, %s119_s15  ;;  %p123_p1 = scmp.lt.u32.totalorder %s119_s15, %s249_s0 }
   0x7   :  { %p125_p2 = pnand %p123_p1, %p120_p0 }
   0x9   :  { %128 = shalt.err (!%p125_p2)
}
   0xa   :  { %s129_s20 = scalar_lea.vmem %s17_s10, 256  ;;  %p134_p4 = scmp.lt.s32.totalorder %s17_s10, %s17_s10 }
   0xb   :  { %p130_p3 = scmp.ne.s32.totalorder %s17_s10, %s129_s20  ;;  %p135_p5 = scmp.lt.s32.totalorder %s129_s20, %s129_s20 }
   0xd   :  { %p136_p6 = por %p135_p5, %p134_p4 }
   0xf   :  { %p137_p7 = pnand %p136_p6, %p130_p3 }
  0x11   :  { %140 = shalt.err (!%p137_p7)
}
  0x12   :  { %19 = dma.hbm_to_vmem [thread:$0]  %s249_s0, 256, %s17_s10, [#allocation4]  }
  0x13   :  { %s141_s25 = scalar_lea.hbm %s250_s1, 256 }
  0x14   :  { %p142_p8 = scmp.ne.s32.totalorder %s250_s1, %s141_s25  ;;  %p145_p9 = scmp.lt.u32.totalorder %s141_s25, %s250_s1 }
  0x16   :  { %p147_p10 = pnand %p145_p9, %p142_p8 }
  0x18   :  { %150 = shalt.err (!%p147_p10)
}
  0x19   :  { %s151_s30 = scalar_lea.vmem %s27_s12, 256  ;;  %p156_p12 = scmp.lt.s32.totalorder %s27_s12, %s27_s12 }
  0x1a   :  { %p152_p11 = scmp.ne.s32.totalorder %s27_s12, %s151_s30  ;;  %p157_p13 = scmp.lt.s32.totalorder %s151_s30, %s151_s30 }
  0x1c   :  { %p158_p0 = por %p157_p13, %p156_p12 }
  0x1e   :  { %p159_p1 = pnand %p158_p0, %p152_p11 }
  0x20   :  { %162 = shalt.err (!%p159_p1)
}
  0x21   :  { %29 = dma.hbm_to_vmem [thread:$0]  %s250_s1, 256, %s27_s12, [#allocation7]  }
  0x22   :  { %185 = dma.done.wait [#allocation4], 256  }
  0x23   :  { %186 = vsyncadd [#allocation4], 4294967040 }
  0x24   :  { %187 = dma.done.wait [#allocation7], 256  }
  0x25   :  { %188 = vsyncadd [#allocation7], 4294967040  ;;  %vm40_vm0 = vcmask 7168   ;;  %v193_v0 = vmov 0.0   ;;  %v42_v1 = vld [vmem:[#allocation3] sm:$0xff]  ;;  %v43_v2 = vld [vmem:[#allocation3 + $0x8] sm:$0xff] }
  0x26   :  { %41 = vst.msk [vmem:[#allocation2] sm:$0xff] %vm40_vm0, %v193_v0  ;;  %v44_v3 = vld [vmem:[#allocation6] sm:$0xff]  ;;  %v45_v4 = vld [vmem:[#allocation6 + $0x8] sm:$0xff]  ;;  %v48_v5 = vadd.f32 0.001, %v42_v1  ;;  %s194_s1 = smov [#allocation8]  }
  0x27   :  { %v49_v6 = vadd.f32 0.001, %v43_v2  ;;  %v54_v7 = vadd.f32 0.001, %v44_v3  ;;  %v55_v8 = vadd.f32 0.001, %v45_v4  ;;  %v46_v15 = vsub.f32 %v42_v1, %v44_v3 }
  0x28   :  { %111 = vlog2.f32 %v48_v5  ;;  %v47_v17 = vsub.f32 %v43_v2, %v45_v4  ;;  %s95_s4 = sshll.u32 %s194_s1, 4  ;;  %vm87_vm1 = vcmask 0   ;;  %s96_s4 = int_to_ptr.vmem [resolvable:$true] %s95_s4 }
  0x29   :  { %113 = vlog2.f32 %v49_v6  ;;  %s163_s6 = scalar_lea.vmem %s96_s4, 16  ;;  %s167_s7 = scalar_lea.vmem %s96_s4, 32 }
  0x2a   :  { %115 = vlog2.f32 %v54_v7  ;;  %p164_p2 = scmp.ne.s32.totalorder %s96_s4, %s163_s6  ;;  %p168_p3 = scmp.lt.s32.totalorder %s96_s4, %s96_s4 }
  0x2b   :  { %117 = vlog2.f32 %v55_v8  ;;  %p169_p4 = scmp.lt.s32.totalorder %s167_s7, %s163_s6 }
  0x2d   :  { %v64_v24 = vld [vmem:[#allocation2] sm:$0xff]  ;;  %p170_p5 = por %p169_p4, %p168_p3 }
  0x2f   :  { %p171_p6 = pnand %p170_p5, %p164_p2 }
  0x32   :  { %v112_v9 = vpop.eup %111 }
  0x33   :  { %v114_v10 = vpop.eup %113  ;;  %v51_v11 = vmul.f32 0.6931472, %v112_v9 }
  0x34   :  { %v116_v12 = vpop.eup %115  ;;  %v53_v13 = vmul.f32 0.6931472, %v114_v10 }
  0x35   :  { %v118_v14 = vpop.eup %117  ;;  %v57_v16 = vmul.f32 0.6931472, %v116_v12 }
  0x36   :  { %v59_v18 = vmul.f32 0.6931472, %v118_v14 }
  0x37   :  { %v60_v19 = vsub.f32 %v51_v11, %v57_v16 }
  0x38   :  { %v61_v20 = vsub.f32 %v53_v13, %v59_v18 }
  0x39   :  { %v62_v21 = vmul.f32 %v60_v19, %v46_v15 }
  0x3a   :  { %v63_v22 = vmul.f32 %v61_v20, %v47_v17 }
  0x3c   :  { %v65_v23 = vadd.f32 %v63_v22, %v62_v21 }
  0x3e   :  { %66 = vadd.xlane.f32.xlu0 %v65_v23 }
  0xcb   :  { %v67_v25 = vpop.xlane.xlu0 %66 }
  0xcc   :  { %v68_v26 = vadd.f32 %v67_v25, %v64_v24 }
  0xce   :  { %70 = vst.msk [vmem:[#allocation2] sm:$0xff] %vm40_vm0, %v68_v26 }
  0xd5   :  { %v74_v27 = vld [vmem:[#allocation2] sm:$0xff] }
  0xd6   :  { %v75_v28 = vand.u32 2147483647, %v74_v27 }
  0xd8   :  { %v76_v29 = vsel %vm40_vm0, %v75_v28, 0.0 }
  0xd9   :  { %77 = vadd.xlane.f32.xlu0 %v76_v29 }
 0x166   :  { %v78_v30 = vpop.xlane.xlu0 %77 }
 0x167   :  { %v79_v31 = vrot.slane %v78_v30, 4 }
 0x169   :  { %v80_v32 = vadd.f32 %v79_v31, %v78_v30 }
 0x16b   :  { %v81_v33 = vrot.slane %v80_v32, 2 }
 0x16d   :  { %v82_v34 = vadd.f32 %v81_v33, %v80_v32 }
 0x16f   :  { %v83_v35 = vrot.slane %v82_v34, 1 }
 0x171   :  { %v84_v36 = vadd.f32 %v83_v35, %v82_v34 }
 0x173   :  { %105 = vpush %v84_v36 }
 0x1a4   :  { %s106_s5 = spop %105 }
 0x1a5   :  { %v86_v37 = vstv %s106_s5 }
 0x1a6   :  { %88 = vst.msk [vmem:[#allocation8] sm:$0x1] %vm87_vm1, %v86_v37 }
 0x1a7   :  { %174 = shalt.err (!%p171_p6)
}
 0x1a8   :  { %s175_s10 = scalar_lea.hbm %s251_s2, 16 }
 0x1a9   :  { %p176_p7 = scmp.ne.s32.totalorder %s251_s2, %s175_s10  ;;  %p179_p8 = scmp.lt.u32.totalorder %s175_s10, %s251_s2 }
 0x1ab   :  { %p181_p9 = pnand %p179_p8, %p176_p7 }
 0x1ad   :  { %184 = shalt.err (!%p181_p9)
}
 0x1ae   :  { %98 = dma.vmem_to_hbm [thread:$0]  %s96_s4, 16, %s251_s2, [#allocation5]  }
 0x1af   :  { %189 = dma.done.wait [#allocation5], 16  }
 0x1b0   :  { %190 = vsyncadd [#allocation5], 4294967280 }
 0x1b1   :  { %102 = vsyncpa [#allocation4], 1 }
 0x1b2   :  { %103 = vsyncpa [#allocation7], 1 }
 0x1b3   :  { %104 = vsyncpa [#allocation5], 1 }

</bundles_post_ra>
